<compile_context>
chip_gen: v7x
topology: tpu7x:2x2x1
jax: 0.10.0
libtpu: 0.0.40
codegen_flags: <defaults>
</compile_context>

<pallas_src>
import jax
import jax.numpy as jnp
from jax.experimental import pallas as pl
from jax.experimental.pallas import tpu as pltpu


def _round_up(x, m):
    return ((x + m - 1) // m) * m


def value_net_kernel(x_ref, w1_ref, b1_ref, w2_ref, b2_ref, w3_ref, b3_ref,
                     o_ref):
    """Fused 3-layer MLP on one batch tile, batch on the lane axis.

    x_ref : (S, TILE_B)  state tile (streamed over the grid, transposed)
    w1/b1 : (H, S) / (H, 1)   grid-resident, torch layout
    w2/b2 : (H, H) / (H, 1)   grid-resident, torch layout
    w3/b3 : (1, H) / (1, 1)
    o_ref : (1, TILE_B)  lane-dense output row; wrapper reshapes to (B, 1)
    """
    x = x_ref[...]
    h1 = jnp.dot(w1_ref[...], x, preferred_element_type=jnp.float32)
    h1 = jnp.maximum(h1 + b1_ref[...], 0.0)          # (H, TILE_B)
    h2 = jnp.dot(w2_ref[...], h1, preferred_element_type=jnp.float32)
    h2 = jnp.maximum(h2 + b2_ref[...], 0.0)          # (H, TILE_B)
    out = jnp.dot(w3_ref[...], h2, preferred_element_type=jnp.float32)
    o_ref[...] = (out + b3_ref[...]).astype(o_ref.dtype)   # (1, TILE_B)


def _choose_tile_b(batch, tile_b):
    """Pick a lane-aligned batch tile size."""
    tile_b = max(_round_up(tile_b, 128), 128)
    if batch <= 128:
        # Single full-lane-width tile; padded columns are compute-free noise.
        return 128
    # Cap the tile so there are >= 2 grid steps: lets the "parallel" batch
    # axis shard across both TensorCores on v7x (harmless on v5e/v6e).
    half = _round_up(pl.cdiv(batch, 2), 128)
    return min(tile_b, half)


def value_net_forward(state, params, *, tile_b=1024):
    """Run the fused ValueNet forward pass on TPU via Pallas.

    state:  (batch, n_states) float32
    params: dict in torch layout: w1 (H,S), b1 (H,1), w2 (H,H), b2 (H,1),
            w3 (1,H), b3 (1,1)
    returns (batch, 1) float32
    """
    batch, n_states = state.shape
    hidden = params["w1"].shape[0]

    tb = _choose_tile_b(batch, tile_b)
    num_tiles = pl.cdiv(batch, tb)
    b_pad = num_tiles * tb

    # Batch on the lane axis: (S, B_pad); zero-pad the extra batch columns
    # (they produce finite junk that the wrapper slices off).
    state_t = state.T
    if b_pad != batch:
        state_t = jnp.pad(state_t, ((0, 0), (0, b_pad - batch)))

    flops = 2 * b_pad * (n_states * hidden + hidden * hidden + hidden)
    param_bytes = 4 * (hidden * n_states + hidden
                       + hidden * hidden + hidden + hidden + 1)
    cost = pl.CostEstimate(flops=flops, transcendentals=0,
                           bytes_accessed=b_pad * n_states * 4
                                          + param_bytes + b_pad * 4)

    # NOTE: if hidden ever grows to the thousands, mark the constant weight
    # BlockSpecs with pipeline_mode=pl.Buffered(1) and K-tile w2 over a
    # second ("arbitrary") grid axis to respect v7x's 64 MiB VMEM.
    # TODO(synk): when called alongside the SAC target-value / Q heads on the
    # same state batch, fuse those MLPs into one pallas_call to share the
    # state DMA and launch overhead (dispatch cost dominates at S=4, H=32).
    out_row = pl.pallas_call(
        value_net_kernel,
        grid=(num_tiles,),
        in_specs=[
            pl.BlockSpec((n_states, tb), lambda i: (0, i)),      # state tile
            pl.BlockSpec((hidden, n_states), lambda i: (0, 0)),  # w1
            pl.BlockSpec((hidden, 1), lambda i: (0, 0)),         # b1
            pl.BlockSpec((hidden, hidden), lambda i: (0, 0)),    # w2
            pl.BlockSpec((hidden, 1), lambda i: (0, 0)),         # b2
            pl.BlockSpec((1, hidden), lambda i: (0, 0)),         # w3
            pl.BlockSpec((1, 1), lambda i: (0, 0)),              # b3
        ],
        out_specs=pl.BlockSpec((1, tb), lambda i: (0, i)),
        out_shape=jax.ShapeDtypeStruct((1, b_pad), jnp.float32),
        compiler_params=pltpu.CompilerParams(
            dimension_semantics=("parallel",)),
        cost_estimate=cost,
    )(state_t, params["w1"], params["b1"], params["w2"], params["b2"],
      params["w3"], params["b3"])

    # Lane-dense (1, b_pad) row -> (batch, 1) column expected by callers.
    return out_row[0, :batch].reshape(batch, 1)


def init_params(key, n_states, hidden_dim, init_w=0.003):
    """Deterministic init mirroring the PyTorch module's __init__.

    linear1/linear2: torch default uniform(-1/sqrt(fan_in), 1/sqrt(fan_in));
    linear3: uniform(-init_w, init_w) for both weight and bias.
    All weights kept in torch (out_features, in_features) layout; biases as
    (out_features, 1) columns so they broadcast over the lane (batch) axis.
    """
    k1, k2, k3, k4, k5, k6 = jax.random.split(key, 6)
    lim1 = 1.0 / jnp.sqrt(float(n_states))
    lim2 = 1.0 / jnp.sqrt(float(hidden_dim))
    return {
        "w1": jax.random.uniform(k1, (hidden_dim, n_states), jnp.float32,
                                 -lim1, lim1),
        "b1": jax.random.uniform(k2, (hidden_dim, 1), jnp.float32,
                                 -lim1, lim1),
        "w2": jax.random.uniform(k3, (hidden_dim, hidden_dim), jnp.float32,
                                 -lim2, lim2),
        "b2": jax.random.uniform(k4, (hidden_dim, 1), jnp.float32,
                                 -lim2, lim2),
        "w3": jax.random.uniform(k5, (1, hidden_dim), jnp.float32,
                                 -init_w, init_w),
        "b3": jax.random.uniform(k6, (1, 1), jnp.float32, -init_w, init_w),
    }


def reference_forward(state, params):
    """Pure-JAX reference (batch-major, torch-style) for correctness checks."""
    h1 = jnp.maximum(state @ params["w1"].T + params["b1"].T, 0.0)
    h2 = jnp.maximum(h1 @ params["w2"].T + params["b2"].T, 0.0)
    return h2 @ params["w3"].T + params["b3"].T


if __name__ == "__main__":
    key = jax.random.PRNGKey(0)
    k_param, k_state, k_state2 = jax.random.split(key, 3)

    n_states = 4       # small control-task observation dim
    hidden_dim = 32
    params = init_params(k_param, n_states, hidden_dim)

    # Small batch: single padded 128-lane tile.
    batch = 8
    state = jax.random.normal(k_state, (batch, n_states), jnp.float32)
    out = jax.block_until_ready(value_net_forward(state, params))
    ref = reference_forward(state, params)
    assert out.shape == (batch, 1), out.shape
    assert jnp.allclose(out, ref, atol=1e-5, rtol=1e-5)

    # Larger, ragged batch: exercises the multi-tile grid (2 tiles of 256,
    # the v7x two-TensorCore path) + batch padding.
    batch2 = 300
    state2 = jax.random.normal(k_state2, (batch2, n_states), jnp.float32)
    out2 = jax.block_until_ready(value_net_forward(state2, params))
    ref2 = reference_forward(state2, params)
    assert out2.shape == (batch2, 1), out2.shape
    assert jnp.allclose(out2, ref2, atol=1e-5, rtol=1e-5)

    print("KERNEL_OK")
</pallas_src>

<mosaic_0001>
module attributes {stable_mosaic.version = 11 : i64} {
  func.func @value_net_kernel(%arg0: i32, %arg1: memref<4x128xf32, #tpu.memory_space<vmem>>, %arg2: memref<32x4xf32, #tpu.memory_space<vmem>>, %arg3: memref<32x1xf32, #tpu.memory_space<vmem>>, %arg4: memref<32x32xf32, #tpu.memory_space<vmem>>, %arg5: memref<32x1xf32, #tpu.memory_space<vmem>>, %arg6: memref<1x32xf32, #tpu.memory_space<vmem>>, %arg7: memref<1x1xf32, #tpu.memory_space<vmem>>, %arg8: memref<1x128xf32, #tpu.memory_space<vmem>>) attributes {dimension_semantics = [#tpu.dimension_semantics<parallel>], iteration_bounds = array<i64: 1>, scalar_prefetch = 0 : i64, scratch_operands = 0 : i64, tpu.core_type = #tpu.core_type<tc>, window_params = [{transform_indices = @transform_0, window_bounds = array<i64: 4, 128>}, {pipeline_mode = #tpu.pipeline_mode<synchronous>, transform_indices = @transform_1, window_bounds = array<i64: 32, 4>}, {pipeline_mode = #tpu.pipeline_mode<synchronous>, transform_indices = @transform_2, window_bounds = array<i64: 32, 1>}, {pipeline_mode = #tpu.pipeline_mode<synchronous>, transform_indices = @transform_3, window_bounds = array<i64: 32, 32>}, {pipeline_mode = #tpu.pipeline_mode<synchronous>, transform_indices = @transform_4, window_bounds = array<i64: 32, 1>}, {pipeline_mode = #tpu.pipeline_mode<synchronous>, transform_indices = @transform_5, window_bounds = array<i64: 1, 32>}, {pipeline_mode = #tpu.pipeline_mode<synchronous>, transform_indices = @transform_6, window_bounds = array<i64: 1, 1>}, {transform_indices = @transform_7, window_bounds = array<i64: 1, 128>}]} {
    %c0 = arith.constant 0 : index
    %c0_0 = arith.constant 0 : index
    %0 = vector.load %arg1[%c0, %c0_0] : memref<4x128xf32, #tpu.memory_space<vmem>>, vector<4x128xf32>
    %c0_1 = arith.constant 0 : index
    %c0_2 = arith.constant 0 : index
    %1 = vector.load %arg2[%c0_1, %c0_2] : memref<32x4xf32, #tpu.memory_space<vmem>>, vector<32x4xf32>
    %cst = arith.constant dense<0.000000e+00> : vector<32x128xf32>
    %2 = tpu.matmul %1, %0, %cst {dimension_numbers = #tpu.dot_dimension_numbers<[1], [0], [0], [1], [0, 0, 1, 1], [], []>} : vector<32x4xf32>, vector<4x128xf32>, vector<32x128xf32> -> vector<32x128xf32>
    %c0_3 = arith.constant 0 : index
    %c0_4 = arith.constant 0 : index
    %3 = vector.load %arg3[%c0_3, %c0_4] : memref<32x1xf32, #tpu.memory_space<vmem>>, vector<32x1xf32>
    %4 = vector.broadcast %3 : vector<32x1xf32> to vector<32x128xf32>
    %5 = arith.addf %2, %4 : vector<32x128xf32>
    %cst_5 = arith.constant 0.000000e+00 : f32
    %6 = vector.broadcast %cst_5 : f32 to vector<32x128xf32>
    %7 = arith.maximumf %5, %6 : vector<32x128xf32>
    %c0_6 = arith.constant 0 : index
    %c0_7 = arith.constant 0 : index
    %8 = vector.load %arg4[%c0_6, %c0_7] : memref<32x32xf32, #tpu.memory_space<vmem>>, vector<32x32xf32>
    %cst_8 = arith.constant dense<0.000000e+00> : vector<32x128xf32>
    %9 = tpu.matmul %8, %7, %cst_8 {dimension_numbers = #tpu.dot_dimension_numbers<[1], [0], [0], [1], [0, 0, 1, 1], [], []>} : vector<32x32xf32>, vector<32x128xf32>, vector<32x128xf32> -> vector<32x128xf32>
    %c0_9 = arith.constant 0 : index
    %c0_10 = arith.constant 0 : index
    %10 = vector.load %arg5[%c0_9, %c0_10] : memref<32x1xf32, #tpu.memory_space<vmem>>, vector<32x1xf32>
    %11 = vector.broadcast %10 : vector<32x1xf32> to vector<32x128xf32>
    %12 = arith.addf %9, %11 : vector<32x128xf32>
    %cst_11 = arith.constant 0.000000e+00 : f32
    %13 = vector.broadcast %cst_11 : f32 to vector<32x128xf32>
    %14 = arith.maximumf %12, %13 : vector<32x128xf32>
    %c0_12 = arith.constant 0 : index
    %c0_13 = arith.constant 0 : index
    %15 = vector.load %arg6[%c0_12, %c0_13] : memref<1x32xf32, #tpu.memory_space<vmem>>, vector<1x32xf32>
    %cst_14 = arith.constant dense<0.000000e+00> : vector<1x128xf32>
    %16 = tpu.matmul %15, %14, %cst_14 {dimension_numbers = #tpu.dot_dimension_numbers<[1], [0], [0], [1], [0, 0, 1, 1], [], []>} : vector<1x32xf32>, vector<32x128xf32>, vector<1x128xf32> -> vector<1x128xf32>
    %c0_15 = arith.constant 0 : index
    %c0_16 = arith.constant 0 : index
    %17 = vector.load %arg7[%c0_15, %c0_16] : memref<1x1xf32, #tpu.memory_space<vmem>>, vector<1x1xf32>
    %18 = vector.broadcast %17 : vector<1x1xf32> to vector<1x128xf32>
    %19 = arith.addf %16, %18 : vector<1x128xf32>
    %c0_17 = arith.constant 0 : index
    %c0_18 = arith.constant 0 : index
    %20 = vector.load %arg8[%c0_17, %c0_18] : memref<1x128xf32, #tpu.memory_space<vmem>>, vector<1x128xf32>
    tpu.vector_store %arg8[%c0_17, %c0_18], %19 {strides = array<i32>} : memref<1x128xf32, #tpu.memory_space<vmem>>, vector<1x128xf32>,
    return
  }
  func.func @transform_0(%arg0: i32) -> (i32, i32) {
    %c0_i32 = arith.constant 0 : i32
    %c0_i32_0 = arith.constant 0 : i32
    return %c0_i32, %arg0 : i32, i32
  }
  func.func @transform_1(%arg0: i32) -> (i32, i32) {
    %c0_i32 = arith.constant 0 : i32
    %c0_i32_0 = arith.constant 0 : i32
    %c0_i32_1 = arith.constant 0 : i32
    return %c0_i32, %c0_i32_0 : i32, i32
  }
  func.func @transform_2(%arg0: i32) -> (i32, i32) {
    %c0_i32 = arith.constant 0 : i32
    %c0_i32_0 = arith.constant 0 : i32
    %c0_i32_1 = arith.constant 0 : i32
    return %c0_i32, %c0_i32_0 : i32, i32
  }
  func.func @transform_3(%arg0: i32) -> (i32, i32) {
    %c0_i32 = arith.constant 0 : i32
    %c0_i32_0 = arith.constant 0 : i32
    %c0_i32_1 = arith.constant 0 : i32
    return %c0_i32, %c0_i32_0 : i32, i32
  }
  func.func @transform_4(%arg0: i32) -> (i32, i32) {
    %c0_i32 = arith.constant 0 : i32
    %c0_i32_0 = arith.constant 0 : i32
    %c0_i32_1 = arith.constant 0 : i32
    return %c0_i32, %c0_i32_0 : i32, i32
  }
  func.func @transform_5(%arg0: i32) -> (i32, i32) {
    %c0_i32 = arith.constant 0 : i32
    %c0_i32_0 = arith.constant 0 : i32
    %c0_i32_1 = arith.constant 0 : i32
    return %c0_i32, %c0_i32_0 : i32, i32
  }
  func.func @transform_6(%arg0: i32) -> (i32, i32) {
    %c0_i32 = arith.constant 0 : i32
    %c0_i32_0 = arith.constant 0 : i32
    %c0_i32_1 = arith.constant 0 : i32
    return %c0_i32, %c0_i32_0 : i32, i32
  }
  func.func @transform_7(%arg0: i32) -> (i32, i32) {
    %c0_i32 = arith.constant 0 : i32
    %c0_i32_0 = arith.constant 0 : i32
    return %c0_i32, %arg0 : i32, i32
  }
}

</mosaic_0001>

<bundles_post_ra>
// kernel: tpu_custom_call.1
= control target key start
LH: loop header
LB: loop body
LE: loop exit
PB: predicated region body
PF: predicated region fallthrough
CT: control target
= control target key end

     0   :  { %s622_s0 = inlined_call_operand.vmem [shape: f32[4,128], index: 0, kind: input, shape index: {}]   ;;  %s623_s1 = inlined_call_operand.vmem [shape: f32[32,4], index: 1, kind: input, shape index: {}]   ;;  %s624_s2 = inlined_call_operand.vmem [shape: f32[32,1], index: 2, kind: input, shape index: {}]   ;;  %s625_s3 = inlined_call_operand.vmem [shape: f32[32,32], index: 3, kind: input, shape index: {}]   ;;  %s626_s4 = inlined_call_operand.vmem [shape: f32[32,1], index: 4, kind: input, shape index: {}]   ;;  %s627_s5 = inlined_call_operand.vmem [shape: f32[1,32], index: 5, kind: input, shape index: {}]   ;;  %s628_s6 = inlined_call_operand.<no memory space> [shape: f32[1,1], index: 6, kind: input, shape index: {}]   ;;  %s629_s7 = inlined_call_operand.hbm [shape: f32[1,128], index: 7, kind: output, shape index: {}]  }
   0x1   :  { %v12_v0 = vstv %s628_s6 }
   0x2   :  { %13 = vst [vmem:[#allocation2] sm:$0x1] %v12_v0 }
   0x3   :  { %v29_v1 = vld [vmem:[%s622_s0] sm:$0xf]  ;;  %vm71_vm0 = vcmask 1043456   ;;  %vm58_vm1 = vcmask 31744   ;;  %v31_v3 = vld [vmem:[%s623_s1 + $0x8] sm:$0xff]  ;;  %v32_v4 = vld [vmem:[%s623_s1 + $0x10] sm:$0xff] }
   0x4   :  { %v30_v2 = vld [vmem:[%s623_s1] sm:$0xff]  ;;  %421 = vmatprep.subr.msk.mxu0 %vm71_vm0, %v29_v1  ;;  %v499_v6 = vmov 0   ;;  %v36_v7 = vld [vmem:[%s624_s2 + $0x10] sm:$0xff]  ;;  %v33_v8 = vld [vmem:[%s623_s1 + $0x18] sm:$0xff] }
   0x5   :  { %423 = vmatprep.mubr.msk.f32.mxu0 %vm58_vm1, %v30_v2  ;;  %v34_v5 = vld [vmem:[%s624_s2] sm:$0xff]  ;;  %422 = vmatpush3.msk.msra.mxu0 %vm71_vm0, %v29_v1  ;;  %v35_v9 = vld [vmem:[%s624_s2 + $0x8] sm:$0xff] }
   0x6   :  { %473 = vset.pattern.permute.xlu0 %v499_v6  ;;  %424 = vmatmul.mubr.msk.f32.vlgmr.msra.gmra.mrb[0].mxu0 %vm58_vm1, %v31_v3 }
   0x7   :  { %40 = vperm.xlu0 %473, %v34_v5   ;;  %426 = vmatprep.mubr.msk.f32.mxu0 %vm58_vm1, %v32_v4 }
   0x8   :  { %474 = vset.pattern.permute.xlu1 %v499_v6 }
   0x9   :  { %14 = vsyncpa [#allocation4], 0  ;;  %50 = vperm.xlu1 %474, %v36_v7   ;;  %v37_v10 = vld [vmem:[%s624_s2 + $0x18] sm:$0xff]  ;;  %v168_v11 = vld [vmem:[%s626_s4] sm:$0xff]  ;;  %vm192_vm2 = vcmask 261120   ;;  %v500_v38 = vmov 0.0|0.0   ;;  %v301_v59 = vlaneseq }
   0xa   :  { %427 = vmatmul.mubr.msk.f32.gmra.mrb[2].mxu0 %vm58_vm1, %v33_v8  ;;  %v169_v12 = vld [vmem:[%s626_s4 + $0x8] sm:$0xff]  ;;  %v170_v13 = vld [vmem:[%s626_s4 + $0x10] sm:$0xff]  ;;  %v171_v14 = vld [vmem:[%s626_s4 + $0x18] sm:$0xff]  ;;  %462 = vmatprep.subr.bf16.mxu0 %v500_v38  ;;  %vm501_vm3 = vmmov 0   ;;  %v502_v39 = vmov 0.0   ;;  %s503_s6 = smov [#allocation3]  }
   0xb   :  { %45 = vperm.xlu0 %473, %v35_v9   ;;  %v295_v15 = vld [vmem:[#allocation2] sm:$0x1]  ;;  %v165_v35 = vld [vmem:[%s625_s3 + $0x8] sm:$0xff]  ;;  %v166_v36 = vld [vmem:[%s625_s3 + $0x10] sm:$0xff]  ;;  %451 = vmatprep.mubr.msk.f32.mxu0 %vm501_vm3, %v502_v39  ;;  %v302_v60 = vshrl.u32 %v301_v59, 7  ;;  %s385_s10 = sshll.u32 %s503_s6, 4  ;;  %s386_s10 = int_to_ptr.vmem [resolvable:$true] %s385_s10 }
   0xc   :  { %v164_v16 = vld [vmem:[%s625_s3] sm:$0xff]  ;;  %v167_v37 = vld [vmem:[%s625_s3 + $0x18] sm:$0xff]  ;;  %s475_s11 = scalar_lea.vmem %s386_s10, 16  ;;  %s479_s0 = scalar_lea.vmem %s386_s10, 32 }
   0xd   :  { %55 = vperm.xlu1 %474, %v37_v10   ;;  %437 = vmatprep.mubr.msk.f32.mxu1 %vm192_vm2, %v164_v16  ;;  %v294_v58 = vld [vmem:[%s627_s5] sm:$0x1]  ;;  %v303_v61 = vsub.s32 0, %v302_v60  ;;  %p476_p0 = scmp.ne.s32.totalorder %s386_s10, %s475_s11  ;;  %p480_p1 = scmp.lt.s32.totalorder %s386_s10, %s386_s10 }
   0xe   :  { %p481_p2 = scmp.lt.s32.totalorder %s479_s0, %s475_s11 }
   0xf   :  { %174 = vperm.xlu0 %473, %v168_v11  }
  0x10   :  { %p482_p3 = por %p481_p2, %p480_p1 }
  0x11   :  { %179 = vperm.xlu1 %474, %v169_v12  }
  0x12   :  { %p483_p4 = pnand %p482_p3, %p476_p0 }
  0x13   :  { %184 = vperm.xlu0 %473, %v170_v13  }
  0x15   :  { %189 = vperm.xlu1 %474, %v171_v14  }
  0x17   :  { %298 = vperm.xlu0 %473, %v295_v15  }
  0x86   :  { %v41_v17 = vpop.permute.xlu0 %40 }
  0x88   :  { %v51_v18 = vpop.permute.xlu1 %50 }
  0x8a   :  { %v46_v19 = vpop.permute.xlu0 %45 }
  0x8c   :  { %v56_v25 = vpop.permute.xlu1 %55 }
  0x8e   :  { %v175_v41 = vpop.permute.xlu0 %174 }
  0x90   :  { %v180_v40 = vpop.permute.xlu1 %179 }
  0x92   :  { %v185_v50 = vpop.permute.xlu0 %184 }
  0x94   :  { %v190_v47 = vpop.permute.xlu1 %189 }
  0x96   :  { %v299_v62 = vpop.permute.xlu0 %298 }
  0x97   :  { %v304_v63 = vrot.slane %v299_v62, %v303_v61 }
  0xd9   :  { %v425_v20 = vpop.f32.mrb[0].mxu0 }
  0xda   :  { %v147_v21 = vadd.f32 %v425_v20, %v46_v19  ;;  %v141_v22 = vpop.f32.mrb[1].mxu0 }
  0xdb   :  { %v142_v23 = vadd.f32 %v141_v22, %v41_v17 }
  0xdc   :  { %v161_v24 = vmax.f32 %v147_v21, 0.0 }
  0xdd   :  { %v160_v26 = vmax.f32 %v142_v23, 0.0  ;;  %v428_v27 = vpop.f32.mrb[2].mxu0 }
  0xde   :  { %v157_v28 = vadd.f32 %v428_v27, %v56_v25  ;;  %v151_v29 = vpop.f32.mrb[3].mxu0 }
  0xdf   :  { %v152_v30 = vadd.f32 %v151_v29, %v51_v18  ;;  %v454_v31 = vpack.c.bf16 %v161_v24, %v160_v26 }
  0xe0   :  { %v163_v32 = vmax.f32 %v157_v28, 0.0 }
  0xe1   :  { %v162_v33 = vmax.f32 %v152_v30, 0.0  ;;  %455 = vmatprep.subr.bf16.mxu1 %v454_v31 }
  0xe2   :  { %457 = vmatpush3.bf16.msra.mxu1 %v454_v31 }
  0xe3   :  { %v458_v34 = vpack.c.bf16 %v163_v32, %v162_v33 }
  0xe5   :  { %459 = vmatprep.subr.bf16.mxu1 %v458_v34 }
  0xe6   :  { %461 = vmatpush3.bf16.msra.mxu1 %v458_v34 }
  0xe9   :  { %438 = vmatmul.mubr.msk.f32.vlgmr.msra.gmra.mrb[0].mxu1 %vm192_vm2, %v165_v35 }
  0xea   :  { %440 = vmatprep.mubr.msk.f32.mxu1 %vm192_vm2, %v166_v36 }
  0xed   :  { %441 = vmatmul.mubr.msk.f32.gmra.mrb[2].mxu1 %vm192_vm2, %v167_v37 }
 0x1bc   :  { %v439_v42 = vpop.f32.mrb[0].mxu1 }
 0x1bd   :  { %v277_v43 = vadd.f32 %v439_v42, %v180_v40  ;;  %v271_v44 = vpop.f32.mrb[1].mxu1 }
 0x1be   :  { %v272_v45 = vadd.f32 %v271_v44, %v175_v41 }
 0x1bf   :  { %v291_v46 = vmax.f32 %v277_v43, 0.0 }
 0x1c0   :  { %v290_v48 = vmax.f32 %v272_v45, 0.0  ;;  %v442_v49 = vpop.f32.mrb[2].mxu1 }
 0x1c1   :  { %v287_v51 = vadd.f32 %v442_v49, %v190_v47  ;;  %v281_v52 = vpop.f32.mrb[3].mxu1 }
 0x1c2   :  { %v463_v53 = vpack.c.bf16 %v291_v46, %v290_v48  ;;  %v282_v54 = vadd.f32 %v281_v52, %v185_v50 }
 0x1c3   :  { %v293_v55 = vmax.f32 %v287_v51, 0.0 }
 0x1c4   :  { %v292_v56 = vmax.f32 %v282_v54, 0.0  ;;  %464 = vmatpush3.bf16.msra.mxu0 %v463_v53 }
 0x1c5   :  { %465 = vmatprep.subr.bf16.mxu0 %v500_v38 }
 0x1c6   :  { %v466_v57 = vpack.c.bf16 %v293_v55, %v292_v56 }
 0x1c8   :  { %467 = vmatpush3.bf16.msra.mxu0 %v466_v57 }
 0x1cb   :  { %452 = vmatmul.mubr.msk.f32.vlgmr.msra.gmra.mrb[4].mxu0 %vm192_vm2, %v294_v58 }
 0x29e   :  { %v374_v0 = vpop.f32.mrb[4].mxu0 }
 0x29f   :  { %v375_v1 = vadd.f32 %v374_v0, %v304_v63  ;;  %v453_v2 = vpop.f32.mrb[5].mxu0 }
 0x2a1   :  { %378 = vst [vmem:[#allocation3] sm:$0x1] %v375_v1 }
 0x2a2   :  { %486 = shalt.err (!%p483_p4)
}
 0x2a3   :  { %s487_s13 = scalar_lea.hbm %s629_s7, 16 }
 0x2a4   :  { %p488_p5 = scmp.ne.s32.totalorder %s629_s7, %s487_s13  ;;  %p491_p6 = scmp.lt.u32.totalorder %s487_s13, %s629_s7 }
 0x2a6   :  { %p493_p7 = pnand %p491_p6, %p488_p5 }
 0x2a8   :  { %496 = shalt.err (!%p493_p7)
}
 0x2a9   :  { %388 = dma.vmem_to_hbm [thread:$0]  %s386_s10, 16, %s629_s7, [#allocation4]  }
 0x2aa   :  { %497 = dma.done.wait [#allocation4], 16  }
 0x2ab   :  { %498 = vsyncadd [#allocation4], 4294967280 }
 0x2ac   :  { %392 = vsyncpa [#allocation4], 1 }

</bundles_post_ra>
